<compile_context>
chip_gen: v7x
topology: tpu7x:2x2x1
jax: 0.10.0
libtpu: 0.0.40
codegen_flags: <defaults>
</compile_context>

<pallas_src>
import functools

import jax
import jax.numpy as jnp
from jax import lax
from jax.experimental import pallas as pl
from jax.experimental.pallas import tpu as pltpu

BN_EPS = 1e-5
MM_DTYPE = jnp.bfloat16  # MXU-native on v5e/v6e/v7x; accumulation is f32.


def _round_up(v, m):
    return (v + m - 1) // m * m


def _vmem_budget_bytes():
    """Generation-aware VMEM budget with headroom (v7x has only 64 MiB/TC)."""
    try:
        cap = int(pltpu.get_tpu_info().vmem_capacity_bytes)
    except Exception:
        cap = 64 * 1024 * 1024  # conservative default (v7x per-TensorCore)
    return int(0.75 * cap)


def _basic_block(a_f32, w, gamma, beta, *, n_valid, n_pad, mm_dtype):
    """Linear (bias-free) + BatchNorm1d(train, biased stats) + ReLU on one tile.

    a_f32: [n_pad, dp] f32 activation, w: [dp, dp] mm_dtype (pre-transposed),
    gamma/beta: [1, dp] f32.  The Linear bias is omitted because train-mode BN
    cancels it exactly (mean absorbs it, variance is unchanged).
    """
    h = jnp.dot(a_f32.astype(mm_dtype), w, preferred_element_type=jnp.float32)

    if n_valid != n_pad:
        row_ok = lax.broadcasted_iota(jnp.int32, (n_pad, 1), 0) < n_valid
        hm = jnp.where(row_ok, h, 0.0)
    else:
        row_ok = None
        hm = h

    inv_n = 1.0 / n_valid
    mean = jnp.sum(hm, axis=0, keepdims=True) * inv_n
    d = h - mean
    if row_ok is not None:
        d = jnp.where(row_ok, d, 0.0)
    var = jnp.sum(d * d, axis=0, keepdims=True) * inv_n

    # Fold BN into one per-feature scale/shift, then a single FMA + ReLU.
    scale = gamma * lax.rsqrt(var + BN_EPS)
    shift = beta - scale * mean
    return jnp.maximum(h * scale + shift, 0.0)


def mlp_onestep_kernel(x_ref, w_ref, gb_ref, o_ref, *, n_valid, n_layers, mm_dtype):
    """Single grid step: all layers resident in VMEM, layer loop unrolled.

    x_ref:  [N_pad, DP]        zero-padded f32 input
    w_ref:  [L, DP, DP]        pre-transposed, zero-padded weights (mm_dtype)
    gb_ref: [L, 2, DP]         rows = (gamma, beta), padded (gamma pad = 1)
    o_ref:  [N_pad, DP]        f32 output
    """
    a = x_ref[...].astype(jnp.float32)
    n_pad = a.shape[0]
    for layer in range(n_layers):  # statically unrolled
        w = w_ref[layer]
        gamma = gb_ref[layer, 0:1, :]
        beta = gb_ref[layer, 1:2, :]
        a = _basic_block(a, w, gamma, beta,
                         n_valid=n_valid, n_pad=n_pad, mm_dtype=mm_dtype)
    o_ref[...] = a.astype(o_ref.dtype)


def mlp_layer_grid_kernel(x_ref, w_ref, gb_ref, o_ref, *, n_valid, mm_dtype):
    """Fallback for large models: one grid step == one layer.

    The activation is carried in o_ref itself: the output BlockSpec returns a
    constant block index across the layer axis, so the tile stays VMEM-resident
    and is written back to HBM only once after the last layer (no scratch).
    """
    layer = pl.program_id(0)

    @pl.when(layer == 0)
    def _():
        o_ref[...] = x_ref[...].astype(o_ref.dtype)

    a = o_ref[...].astype(jnp.float32)
    n_pad = a.shape[0]
    gamma = gb_ref[0:1, :]
    beta = gb_ref[1:2, :]
    y = _basic_block(a, w_ref[...], gamma, beta,
                     n_valid=n_valid, n_pad=n_pad, mm_dtype=mm_dtype)
    o_ref[...] = y.astype(o_ref.dtype)


@functools.partial(jax.jit, static_argnames=("n_valid", "out_dim", "force_path"))
def fused_mlp(x_pad, w_stack, gb, n_valid, out_dim, force_path="auto"):
    """x_pad: [N_pad, DP] f32, w_stack: [L, DP, DP] mm_dtype, gb: [L, 2, DP] f32."""
    n_pad, dp = x_pad.shape
    n_layers = w_stack.shape[0]
    mm_dtype = w_stack.dtype
    itemsize = jnp.dtype(mm_dtype).itemsize

    budget = _vmem_budget_bytes()
    resident_bytes = 2 * n_pad * dp * 4                                # x + out tiles
    all_weights_bytes = n_layers * (dp * dp * itemsize + 2 * dp * 4)   # W + (gamma,beta)
    onestep_est = resident_bytes + all_weights_bytes

    use_onestep = (force_path == "onestep") or (
        force_path == "auto" and onestep_est <= budget // 2)

    if use_onestep:
        kernel = functools.partial(mlp_onestep_kernel, n_valid=n_valid,
                                   n_layers=n_layers, mm_dtype=mm_dtype)
        vmem_limit = int(min(max(2 * onestep_est, 32 * 1024 * 1024), budget))
        out = pl.pallas_call(
            kernel,
            out_shape=jax.ShapeDtypeStruct((n_pad, dp), jnp.float32),
            grid_spec=pltpu.PrefetchScalarGridSpec(
                num_scalar_prefetch=0,
                grid=(1,),
                in_specs=[
                    pl.BlockSpec((n_pad, dp), lambda i: (0, 0)),
                    pl.BlockSpec((n_layers, dp, dp), lambda i: (0, 0, 0)),
                    pl.BlockSpec((n_layers, 2, dp), lambda i: (0, 0, 0)),
                ],
                out_specs=pl.BlockSpec((n_pad, dp), lambda i: (0, 0)),
            ),
            compiler_params=pltpu.CompilerParams(
                dimension_semantics=("arbitrary",),
                vmem_limit_bytes=vmem_limit,
            ),
        )(x_pad, w_stack, gb)
    else:
        kernel = functools.partial(mlp_layer_grid_kernel, n_valid=n_valid,
                                   mm_dtype=mm_dtype)
        per_step_est = 2 * dp * dp * itemsize + 2 * 2 * dp * 4 + resident_bytes
        vmem_limit = int(min(max(2 * per_step_est, 32 * 1024 * 1024), budget))
        out = pl.pallas_call(
            kernel,
            out_shape=jax.ShapeDtypeStruct((n_pad, dp), jnp.float32),
            grid_spec=pltpu.PrefetchScalarGridSpec(
                num_scalar_prefetch=0,
                grid=(n_layers,),
                in_specs=[
                    pl.BlockSpec((n_pad, dp), lambda l: (0, 0)),        # x (resident)
                    pl.BlockSpec((None, dp, dp), lambda l: (l, 0, 0)),  # W_l (streamed)
                    pl.BlockSpec((None, 2, dp), lambda l: (l, 0, 0)),   # (gamma, beta)_l
                ],
                out_specs=pl.BlockSpec((n_pad, dp), lambda l: (0, 0)),  # act carrier
            ),
            compiler_params=pltpu.CompilerParams(
                dimension_semantics=("arbitrary",),   # layers carry state sequentially
                vmem_limit_bytes=vmem_limit,
            ),
        )(x_pad, w_stack, gb)
    return out[:n_valid, :out_dim]


def init_mlp_params(key, input_dim, hidden_dim, n_layers):
    """Shapes matching the PyTorch module. Linear: W [out, in] ~ U(+-1/sqrt(in))."""
    dims = [(input_dim, hidden_dim)] + [(hidden_dim, hidden_dim)] * (n_layers - 1)
    params = []
    for (d_in, d_out) in dims:
        key, kw, kb = jax.random.split(key, 3)
        bound = 1.0 / (d_in ** 0.5)
        w = jax.random.uniform(kw, (d_out, d_in), jnp.float32, -bound, bound)
        b = jax.random.uniform(kb, (d_out,), jnp.float32, -bound, bound)
        params.append(
            dict(
                w_t=w.T,                               # [d_in, d_out]
                b=b,                                   # kept for the reference only
                gamma=jnp.ones((d_out,), jnp.float32),
                beta=jnp.zeros((d_out,), jnp.float32),
            )
        )
    return params


def pack_params(params, input_dim, hidden_dim, mm_dtype):
    """Stack per-layer params into lane-dense padded arrays for the fused kernel.

    The Linear bias is intentionally NOT packed: train-mode BatchNorm cancels it
    exactly, so the kernel never needs it.
    """
    dp = max(_round_up(input_dim, 128), _round_up(hidden_dim, 128))
    n_layers = len(params)
    w_stack = jnp.zeros((n_layers, dp, dp), jnp.float32)
    gb = jnp.zeros((n_layers, 2, dp), jnp.float32)
    gb = gb.at[:, 0, :].set(1.0)  # gamma pad = 1 keeps padded columns at exactly 0
    for l, p in enumerate(params):
        d_in, d_out = p["w_t"].shape
        w_stack = w_stack.at[l, :d_in, :d_out].set(p["w_t"])
        gb = gb.at[l, 0, :d_out].set(p["gamma"])
        gb = gb.at[l, 1, :d_out].set(p["beta"])
    return w_stack.astype(mm_dtype), gb, dp


def mlp_reference(x, params):
    """Pure-JAX f32 reference (matches PyTorch BasicBlock forward, BN train mode)."""
    for p in params:
        h = x @ p["w_t"] + p["b"][None, :]
        mean = jnp.mean(h, axis=0, keepdims=True)
        var = jnp.mean((h - mean) ** 2, axis=0, keepdims=True)
        xhat = (h - mean) / jnp.sqrt(var + BN_EPS)
        x = jnp.maximum(p["gamma"][None, :] * xhat + p["beta"][None, :], 0.0)
    return x


if __name__ == "__main__":
    # MLP(input_dim=32, hidden_dim=32, n_layers=3)  (reversible=False, residual=False)
    batch, input_dim, hidden_dim, n_layers = 8, 32, 32, 3

    key = jax.random.PRNGKey(0)
    key, kx = jax.random.split(key)
    x = jax.random.normal(kx, (batch, input_dim), jnp.float32)
    params = init_mlp_params(key, input_dim, hidden_dim, n_layers)

    w_stack, gb, dp = pack_params(params, input_dim, hidden_dim, MM_DTYPE)

    n_pad = _round_up(batch, 8)
    x_pad = jnp.zeros((n_pad, dp), jnp.float32).at[:batch, :input_dim].set(x)

    ref = mlp_reference(x, params)
    tol = 5e-2 if w_stack.dtype == jnp.bfloat16 else 1e-4

    # Primary (single-step, fully fused) path.
    out = fused_mlp(x_pad, w_stack, gb, batch, hidden_dim, force_path="onestep")
    out = jax.block_until_ready(out)
    assert out.shape == (batch, hidden_dim)
    assert jnp.allclose(out, ref, atol=tol, rtol=tol), "onestep mismatch vs reference"

    # Layer-grid fallback path (used automatically for large L*dp^2).
    out2 = fused_mlp(x_pad, w_stack, gb, batch, hidden_dim, force_path="layergrid")
    out2 = jax.block_until_ready(out2)
    assert out2.shape == (batch, hidden_dim)
    assert jnp.allclose(out2, ref, atol=tol, rtol=tol), "layergrid mismatch vs reference"

    print("KERNEL_OK")
</pallas_src>

<mosaic_0001>
module attributes {stable_mosaic.version = 11 : i64} {
  func.func @mlp_onestep_kernel(%arg0: i32, %arg1: memref<8x128xf32, #tpu.memory_space<vmem>>, %arg2: memref<3x128x128xbf16, #tpu.memory_space<vmem>>, %arg3: memref<3x2x128xf32, #tpu.memory_space<vmem>>, %arg4: memref<8x128xf32, #tpu.memory_space<vmem>>) attributes {dimension_semantics = [#tpu.dimension_semantics<arbitrary>], iteration_bounds = array<i64: 1>, scalar_prefetch = 0 : i64, scratch_operands = 0 : i64, tpu.core_type = #tpu.core_type<tc>, window_params = [{pipeline_mode = #tpu.pipeline_mode<synchronous>, transform_indices = @transform_0, window_bounds = array<i64: 8, 128>}, {pipeline_mode = #tpu.pipeline_mode<synchronous>, transform_indices = @transform_1, window_bounds = array<i64: 3, 128, 128>}, {pipeline_mode = #tpu.pipeline_mode<synchronous>, transform_indices = @transform_2, window_bounds = array<i64: 3, 2, 128>}, {pipeline_mode = #tpu.pipeline_mode<synchronous>, transform_indices = @transform_3, window_bounds = array<i64: 8, 128>}]} {
    %c0 = arith.constant 0 : index
    %c0_0 = arith.constant 0 : index
    %0 = vector.load %arg1[%c0, %c0_0] : memref<8x128xf32, #tpu.memory_space<vmem>>, vector<8x128xf32>
    %c0_1 = arith.constant 0 : index
    %c0_2 = arith.constant 0 : index
    %c0_3 = arith.constant 0 : index
    %1 = vector.load %arg2[%c0_1, %c0_2, %c0_3] : memref<3x128x128xbf16, #tpu.memory_space<vmem>>, vector<1x128x128xbf16>
    %2 = vector.shape_cast %1 : vector<1x128x128xbf16> to vector<128x128xbf16>
    %c0_4 = arith.constant 0 : index
    %c0_5 = arith.constant 0 : index
    %c0_6 = arith.constant 0 : index
    %3 = vector.load %arg3[%c0_4, %c0_5, %c0_6] : memref<3x2x128xf32, #tpu.memory_space<vmem>>, vector<1x1x128xf32>
    %4 = vector.shape_cast %3 : vector<1x1x128xf32> to vector<1x128xf32>
    %c0_7 = arith.constant 0 : index
    %c1 = arith.constant 1 : index
    %c0_8 = arith.constant 0 : index
    %5 = vector.load %arg3[%c0_7, %c1, %c0_8] : memref<3x2x128xf32, #tpu.memory_space<vmem>>, vector<1x1x128xf32>
    %6 = vector.shape_cast %5 : vector<1x1x128xf32> to vector<1x128xf32>
    %7 = arith.truncf %0 : vector<8x128xf32> to vector<8x128xbf16>
    %cst = arith.constant dense<0.000000e+00> : vector<8x128xf32>
    %8 = tpu.matmul %7, %2, %cst {dimension_numbers = #tpu.dot_dimension_numbers<[1], [0], [0], [1], [0, 0, 1, 1], [], []>} : vector<8x128xbf16>, vector<128x128xbf16>, vector<8x128xf32> -> vector<8x128xf32>
    %cst_9 = arith.constant dense<0.000000e+00> : vector<128xf32>
    %9 = vector.multi_reduction <add>, %8, %cst_9 [0] : vector<8x128xf32> to vector<128xf32>
    %10 = vector.shape_cast %9 : vector<128xf32> to vector<1x128xf32>
    %cst_10 = arith.constant 1.250000e-01 : f32
    %11 = vector.broadcast %cst_10 : f32 to vector<1x128xf32>
    %12 = arith.mulf %10, %11 : vector<1x128xf32>
    %13 = vector.broadcast %12 : vector<1x128xf32> to vector<8x128xf32>
    %14 = arith.subf %8, %13 : vector<8x128xf32>
    %15 = arith.mulf %14, %14 : vector<8x128xf32>
    %cst_11 = arith.constant dense<0.000000e+00> : vector<128xf32>
    %16 = vector.multi_reduction <add>, %15, %cst_11 [0] : vector<8x128xf32> to vector<128xf32>
    %17 = vector.shape_cast %16 : vector<128xf32> to vector<1x128xf32>
    %cst_12 = arith.constant 1.250000e-01 : f32
    %18 = vector.broadcast %cst_12 : f32 to vector<1x128xf32>
    %19 = arith.mulf %17, %18 : vector<1x128xf32>
    %cst_13 = arith.constant 9.99999974E-6 : f32
    %20 = vector.broadcast %cst_13 : f32 to vector<1x128xf32>
    %21 = arith.addf %19, %20 : vector<1x128xf32>
    %22 = math.rsqrt %21 : vector<1x128xf32>
    %23 = arith.mulf %4, %22 : vector<1x128xf32>
    %24 = arith.mulf %23, %12 : vector<1x128xf32>
    %25 = arith.subf %6, %24 : vector<1x128xf32>
    %26 = vector.broadcast %23 : vector<1x128xf32> to vector<8x128xf32>
    %27 = arith.mulf %8, %26 : vector<8x128xf32>
    %28 = vector.broadcast %25 : vector<1x128xf32> to vector<8x128xf32>
    %29 = arith.addf %27, %28 : vector<8x128xf32>
    %cst_14 = arith.constant 0.000000e+00 : f32
    %30 = vector.broadcast %cst_14 : f32 to vector<8x128xf32>
    %31 = arith.maximumf %29, %30 : vector<8x128xf32>
    %c1_15 = arith.constant 1 : index
    %c0_16 = arith.constant 0 : index
    %c0_17 = arith.constant 0 : index
    %32 = vector.load %arg2[%c1_15, %c0_16, %c0_17] : memref<3x128x128xbf16, #tpu.memory_space<vmem>>, vector<1x128x128xbf16>
    %33 = vector.shape_cast %32 : vector<1x128x128xbf16> to vector<128x128xbf16>
    %c1_18 = arith.constant 1 : index
    %c0_19 = arith.constant 0 : index
    %c0_20 = arith.constant 0 : index
    %34 = vector.load %arg3[%c1_18, %c0_19, %c0_20] : memref<3x2x128xf32, #tpu.memory_space<vmem>>, vector<1x1x128xf32>
    %35 = vector.shape_cast %34 : vector<1x1x128xf32> to vector<1x128xf32>
    %c1_21 = arith.constant 1 : index
    %c1_22 = arith.constant 1 : index
    %c0_23 = arith.constant 0 : index
    %36 = vector.load %arg3[%c1_21, %c1_22, %c0_23] : memref<3x2x128xf32, #tpu.memory_space<vmem>>, vector<1x1x128xf32>
    %37 = vector.shape_cast %36 : vector<1x1x128xf32> to vector<1x128xf32>
    %38 = arith.truncf %31 : vector<8x128xf32> to vector<8x128xbf16>
    %cst_24 = arith.constant dense<0.000000e+00> : vector<8x128xf32>
    %39 = tpu.matmul %38, %33, %cst_24 {dimension_numbers = #tpu.dot_dimension_numbers<[1], [0], [0], [1], [0, 0, 1, 1], [], []>} : vector<8x128xbf16>, vector<128x128xbf16>, vector<8x128xf32> -> vector<8x128xf32>
    %cst_25 = arith.constant dense<0.000000e+00> : vector<128xf32>
    %40 = vector.multi_reduction <add>, %39, %cst_25 [0] : vector<8x128xf32> to vector<128xf32>
    %41 = vector.shape_cast %40 : vector<128xf32> to vector<1x128xf32>
    %cst_26 = arith.constant 1.250000e-01 : f32
    %42 = vector.broadcast %cst_26 : f32 to vector<1x128xf32>
    %43 = arith.mulf %41, %42 : vector<1x128xf32>
    %44 = vector.broadcast %43 : vector<1x128xf32> to vector<8x128xf32>
    %45 = arith.subf %39, %44 : vector<8x128xf32>
    %46 = arith.mulf %45, %45 : vector<8x128xf32>
    %cst_27 = arith.constant dense<0.000000e+00> : vector<128xf32>
    %47 = vector.multi_reduction <add>, %46, %cst_27 [0] : vector<8x128xf32> to vector<128xf32>
    %48 = vector.shape_cast %47 : vector<128xf32> to vector<1x128xf32>
    %cst_28 = arith.constant 1.250000e-01 : f32
    %49 = vector.broadcast %cst_28 : f32 to vector<1x128xf32>
    %50 = arith.mulf %48, %49 : vector<1x128xf32>
    %cst_29 = arith.constant 9.99999974E-6 : f32
    %51 = vector.broadcast %cst_29 : f32 to vector<1x128xf32>
    %52 = arith.addf %50, %51 : vector<1x128xf32>
    %53 = math.rsqrt %52 : vector<1x128xf32>
    %54 = arith.mulf %35, %53 : vector<1x128xf32>
    %55 = arith.mulf %54, %43 : vector<1x128xf32>
    %56 = arith.subf %37, %55 : vector<1x128xf32>
    %57 = vector.broadcast %54 : vector<1x128xf32> to vector<8x128xf32>
    %58 = arith.mulf %39, %57 : vector<8x128xf32>
    %59 = vector.broadcast %56 : vector<1x128xf32> to vector<8x128xf32>
    %60 = arith.addf %58, %59 : vector<8x128xf32>
    %cst_30 = arith.constant 0.000000e+00 : f32
    %61 = vector.broadcast %cst_30 : f32 to vector<8x128xf32>
    %62 = arith.maximumf %60, %61 : vector<8x128xf32>
    %c2 = arith.constant 2 : index
    %c0_31 = arith.constant 0 : index
    %c0_32 = arith.constant 0 : index
    %63 = vector.load %arg2[%c2, %c0_31, %c0_32] : memref<3x128x128xbf16, #tpu.memory_space<vmem>>, vector<1x128x128xbf16>
    %64 = vector.shape_cast %63 : vector<1x128x128xbf16> to vector<128x128xbf16>
    %c2_33 = arith.constant 2 : index
    %c0_34 = arith.constant 0 : index
    %c0_35 = arith.constant 0 : index
    %65 = vector.load %arg3[%c2_33, %c0_34, %c0_35] : memref<3x2x128xf32, #tpu.memory_space<vmem>>, vector<1x1x128xf32>
    %66 = vector.shape_cast %65 : vector<1x1x128xf32> to vector<1x128xf32>
    %c2_36 = arith.constant 2 : index
    %c1_37 = arith.constant 1 : index
    %c0_38 = arith.constant 0 : index
    %67 = vector.load %arg3[%c2_36, %c1_37, %c0_38] : memref<3x2x128xf32, #tpu.memory_space<vmem>>, vector<1x1x128xf32>
    %68 = vector.shape_cast %67 : vector<1x1x128xf32> to vector<1x128xf32>
    %69 = arith.truncf %62 : vector<8x128xf32> to vector<8x128xbf16>
    %cst_39 = arith.constant dense<0.000000e+00> : vector<8x128xf32>
    %70 = tpu.matmul %69, %64, %cst_39 {dimension_numbers = #tpu.dot_dimension_numbers<[1], [0], [0], [1], [0, 0, 1, 1], [], []>} : vector<8x128xbf16>, vector<128x128xbf16>, vector<8x128xf32> -> vector<8x128xf32>
    %cst_40 = arith.constant dense<0.000000e+00> : vector<128xf32>
    %71 = vector.multi_reduction <add>, %70, %cst_40 [0] : vector<8x128xf32> to vector<128xf32>
    %72 = vector.shape_cast %71 : vector<128xf32> to vector<1x128xf32>
    %cst_41 = arith.constant 1.250000e-01 : f32
    %73 = vector.broadcast %cst_41 : f32 to vector<1x128xf32>
    %74 = arith.mulf %72, %73 : vector<1x128xf32>
    %75 = vector.broadcast %74 : vector<1x128xf32> to vector<8x128xf32>
    %76 = arith.subf %70, %75 : vector<8x128xf32>
    %77 = arith.mulf %76, %76 : vector<8x128xf32>
    %cst_42 = arith.constant dense<0.000000e+00> : vector<128xf32>
    %78 = vector.multi_reduction <add>, %77, %cst_42 [0] : vector<8x128xf32> to vector<128xf32>
    %79 = vector.shape_cast %78 : vector<128xf32> to vector<1x128xf32>
    %cst_43 = arith.constant 1.250000e-01 : f32
    %80 = vector.broadcast %cst_43 : f32 to vector<1x128xf32>
    %81 = arith.mulf %79, %80 : vector<1x128xf32>
    %cst_44 = arith.constant 9.99999974E-6 : f32
    %82 = vector.broadcast %cst_44 : f32 to vector<1x128xf32>
    %83 = arith.addf %81, %82 : vector<1x128xf32>
    %84 = math.rsqrt %83 : vector<1x128xf32>
    %85 = arith.mulf %66, %84 : vector<1x128xf32>
    %86 = arith.mulf %85, %74 : vector<1x128xf32>
    %87 = arith.subf %68, %86 : vector<1x128xf32>
    %88 = vector.broadcast %85 : vector<1x128xf32> to vector<8x128xf32>
    %89 = arith.mulf %70, %88 : vector<8x128xf32>
    %90 = vector.broadcast %87 : vector<1x128xf32> to vector<8x128xf32>
    %91 = arith.addf %89, %90 : vector<8x128xf32>
    %cst_45 = arith.constant 0.000000e+00 : f32
    %92 = vector.broadcast %cst_45 : f32 to vector<8x128xf32>
    %93 = arith.maximumf %91, %92 : vector<8x128xf32>
    %c0_46 = arith.constant 0 : index
    %c0_47 = arith.constant 0 : index
    %94 = vector.load %arg4[%c0_46, %c0_47] : memref<8x128xf32, #tpu.memory_space<vmem>>, vector<8x128xf32>
    tpu.vector_store %arg4[%c0_46, %c0_47], %93 {strides = array<i32>} : memref<8x128xf32, #tpu.memory_space<vmem>>, vector<8x128xf32>,
    return
  }
  func.func @transform_0(%arg0: i32) -> (i32, i32) {
    %c0_i32 = arith.constant 0 : i32
    %c0_i32_0 = arith.constant 0 : i32
    %c0_i32_1 = arith.constant 0 : i32
    return %c0_i32, %c0_i32_0 : i32, i32
  }
  func.func @transform_1(%arg0: i32) -> (i32, i32, i32) {
    %c0_i32 = arith.constant 0 : i32
    %c0_i32_0 = arith.constant 0 : i32
    %c0_i32_1 = arith.constant 0 : i32
    %c0_i32_2 = arith.constant 0 : i32
    return %c0_i32, %c0_i32_0, %c0_i32_1 : i32, i32, i32
  }
  func.func @transform_2(%arg0: i32) -> (i32, i32, i32) {
    %c0_i32 = arith.constant 0 : i32
    %c0_i32_0 = arith.constant 0 : i32
    %c0_i32_1 = arith.constant 0 : i32
    %c0_i32_2 = arith.constant 0 : i32
    return %c0_i32, %c0_i32_0, %c0_i32_1 : i32, i32, i32
  }
  func.func @transform_3(%arg0: i32) -> (i32, i32) {
    %c0_i32 = arith.constant 0 : i32
    %c0_i32_0 = arith.constant 0 : i32
    %c0_i32_1 = arith.constant 0 : i32
    return %c0_i32, %c0_i32_0 : i32, i32
  }
}

</mosaic_0001>

<bundles_post_ra>
// kernel: fused_mlp.1
= control target key start
LH: loop header
LB: loop body
LE: loop exit
PB: predicated region body
PF: predicated region fallthrough
CT: control target
= control target key end

     0   :  { %8 = vsyncpa [#allocation3], 0  ;;  %s831_s0 = inlined_call_operand.hbm [shape: f32[8,128], index: 0, kind: input, shape index: {}]   ;;  %s832_s1 = inlined_call_operand.hbm [shape: bf16[3,128,128], index: 1, kind: input, shape index: {}]   ;;  %s833_s2 = inlined_call_operand.vmem [shape: f32[3,2,128], index: 2, kind: input, shape index: {}]   ;;  %s834_s3 = inlined_call_operand.hbm [shape: f32[8,128], index: 3, kind: output, shape index: {}]  }
   0x1   :  { %9 = vsyncpa [#allocation6], 0 }
   0x2   :  { %10 = vsyncpa [#allocation4], 0  ;;  %s705_s12 = smov [#allocation2]   ;;  %s706_s14 = smov [#allocation5]  }
   0x3   :  { %s17_s13 = sshll.u32 %s705_s12, 4  ;;  %s26_s15 = sshll.u32 %s706_s14, 4  ;;  %s18_s13 = int_to_ptr.vmem [resolvable:$true] %s17_s13  ;;  %s732_s15 = int_to_ptr.vmem [resolvable:$true] %s26_s15 }
   0x4   :  { %s633_s18 = scalar_lea.hbm %s831_s0, 128 }
   0x5   :  { %p634_p0 = scmp.ne.s32.totalorder %s831_s0, %s633_s18  ;;  %p637_p1 = scmp.lt.u32.totalorder %s633_s18, %s831_s0 }
   0x7   :  { %p639_p2 = pnand %p637_p1, %p634_p0 }
   0x9   :  { %642 = shalt.err (!%p639_p2)
}
   0xa   :  { %s643_s23 = scalar_lea.vmem %s18_s13, 128  ;;  %p648_p4 = scmp.lt.s32.totalorder %s18_s13, %s18_s13 }
   0xb   :  { %p644_p3 = scmp.ne.s32.totalorder %s18_s13, %s643_s23  ;;  %p649_p5 = scmp.lt.s32.totalorder %s643_s23, %s643_s23 }
   0xd   :  { %p650_p6 = por %p649_p5, %p648_p4 }
   0xf   :  { %p651_p7 = pnand %p650_p6, %p644_p3 }
  0x11   :  { %654 = shalt.err (!%p651_p7)
}
  0x12   :  { %20 = dma.hbm_to_vmem [thread:$0]  %s831_s0, 128, %s18_s13, [#allocation3]  }
  0x13   :  { %s655_s28 = scalar_lea.hbm %s832_s1, 3072 }
  0x14   :  { %p656_p8 = scmp.ne.s32.totalorder %s832_s1, %s655_s28  ;;  %p659_p9 = scmp.lt.u32.totalorder %s655_s28, %s832_s1 }
  0x16   :  { %p661_p10 = pnand %p659_p9, %p656_p8 }
  0x18   :  { %664 = shalt.err (!%p661_p10)
}
  0x19   :  { %s665_s6 = scalar_lea.vmem %s732_s15, 3072  ;;  %p670_p12 = scmp.lt.s32.totalorder %s732_s15, %s732_s15 }
  0x1a   :  { %p666_p11 = scmp.ne.s32.totalorder %s732_s15, %s665_s6  ;;  %p671_p13 = scmp.lt.s32.totalorder %s665_s6, %s665_s6 }
  0x1c   :  { %p672_p0 = por %p671_p13, %p670_p12 }
  0x1e   :  { %p673_p1 = pnand %p672_p0, %p666_p11 }
  0x20   :  { %676 = shalt.err (!%p673_p1)
}
  0x21   :  { %s707_s0 = smov 64   ;;  %s708_s7 = smov 4  }
  0x22   :  { %32 = dma.hbm_to_vmem [thread:$0]  %s832_s1, 3072, %s732_s15, [#allocation6], %s707_s0, %s707_s0, %s708_s7  }
  0x23   :  { %699 = dma.done.wait [#allocation3], 128  }
  0x24   :  { %700 = vsyncadd [#allocation3], 4294967168 }
  0x25   :  { %701 = dma.done.wait [#allocation6], 3072  }
  0x26   :  { %702 = vsyncadd [#allocation6], 4294964224  ;;  %v709_v0 = vmov 0.0   ;;  %vm710_vm0 = vmmov 0   ;;  %v603_v1 = vld [vmem:[#allocation5] sm:$0xff]   ;;  %v604_v2 = vld [vmem:[#allocation5 + $0x8] sm:$0xff]   ;;  %v171_v40 = vlaneseq }
  0x27   :  { %536 = vmatprep.subr.bf16.mxu0 %v709_v0  ;;  %552 = vmatprep.mubr.msk.bf16.mxu0 %vm710_vm0, %v709_v0  ;;  %v605_v3 = vld [vmem:[#allocation5 + $0x10] sm:$0xff]   ;;  %v606_v4 = vld [vmem:[#allocation5 + $0x18] sm:$0xff]   ;;  %v607_v5 = vld [vmem:[#allocation5 + $0x20] sm:$0xff]   ;;  %s711_s21 = smov [#allocation7]  }
  0x28   :  { %556 = vmatprep.subr.bf16.mxu1 %v709_v0  ;;  %572 = vmatprep.mubr.msk.bf16.mxu1 %vm710_vm0, %v709_v0  ;;  %v608_v6 = vld [vmem:[#allocation5 + $0x28] sm:$0xff]   ;;  %v609_v7 = vld [vmem:[#allocation5 + $0x30] sm:$0xff]   ;;  %v610_v8 = vld [vmem:[#allocation5 + $0x38] sm:$0xff]   ;;  %v172_v41 = vshrl.u32 %v171_v40, 7  ;;  %s471_s22 = sshll.u32 %s711_s21, 4  ;;  %s472_s22 = int_to_ptr.vmem [resolvable:$true] %s471_s22 }
  0x29   :  { %537 = vmatpush3.bf16.msra.mxu0 %v603_v1  ;;  %v42_v9 = vld [vmem:[#allocation2] sm:$0xff]  ;;  %v611_v11 = vld [vmem:[#allocation5 + $0x40] sm:$0xff]   ;;  %v612_v12 = vld [vmem:[#allocation5 + $0x48] sm:$0xff]   ;;  %s677_s23 = scalar_lea.vmem %s472_s22, 128  ;;  %p682_p3 = scmp.lt.s32.totalorder %s472_s22, %s472_s22 }
  0x2a   :  { %538 = vmatprep.subr.bf16.mxu0 %v709_v0  ;;  %v61_v10 = vpack.c.bf16 %v42_v9, %v42_v9  ;;  %557 = vmatpush3.bf16.msra.mxu1 %v611_v11  ;;  %v613_v13 = vld [vmem:[#allocation5 + $0x50] sm:$0xff]   ;;  %v614_v14 = vld [vmem:[#allocation5 + $0x58] sm:$0xff]   ;;  %v615_v15 = vld [vmem:[#allocation5 + $0x60] sm:$0xff]   ;;  %v789_v43 = vsub.s32 0, %v172_v41  ;;  %p678_p2 = scmp.ne.s32.totalorder %s472_s22, %s677_s23  ;;  %p683_p4 = scmp.lt.s32.totalorder %s677_s23, %s677_s23 }
  0x2b   :  { %558 = vmatprep.subr.bf16.mxu1 %v709_v0  ;;  %v616_v16 = vld [vmem:[#allocation5 + $0x68] sm:$0xff]   ;;  %v617_v17 = vld [vmem:[#allocation5 + $0x70] sm:$0xff]   ;;  %v618_v18 = vld [vmem:[#allocation5 + $0x78] sm:$0xff]  }
  0x2c   :  { %v59_v42 = vld [vmem:[%s833_s2] sm:$0x1]  ;;  %v60_v46 = vld [vmem:[%s833_s2 + $0x1] sm:$0x1]  ;;  %v619_v55 = vld [vmem:[#allocation5 + $0x80] sm:$0xff]   ;;  %p684_p5 = por %p683_p4, %p682_p3 }
  0x2d   :  { %539 = vmatpush3.bf16.msra.mxu0 %v604_v2  ;;  %v620_v56 = vld [vmem:[#allocation5 + $0x88] sm:$0xff]   ;;  %v621_v57 = vld [vmem:[#allocation5 + $0x90] sm:$0xff]   ;;  %v622_v58 = vld [vmem:[#allocation5 + $0x98] sm:$0xff]  }
  0x2e   :  { %540 = vmatprep.subr.bf16.mxu0 %v709_v0  ;;  %559 = vmatpush3.bf16.msra.mxu1 %v612_v12  ;;  %v623_v59 = vld [vmem:[#allocation5 + $0xa0] sm:$0xff]   ;;  %v624_v60 = vld [vmem:[#allocation5 + $0xa8] sm:$0xff]   ;;  %v625_v61 = vld [vmem:[#allocation5 + $0xb0] sm:$0xff]   ;;  %p685_p6 = pnand %p684_p5, %p678_p2 }
  0x2f   :  { %560 = vmatprep.subr.bf16.mxu1 %v709_v0  ;;  %v626_v62 = vld [vmem:[#allocation5 + $0xb8] sm:$0xff]  }
  0x31   :  { %541 = vmatpush3.bf16.msra.mxu0 %v605_v3 }
  0x32   :  { %542 = vmatprep.subr.bf16.mxu0 %v709_v0  ;;  %561 = vmatpush3.bf16.msra.mxu1 %v613_v13 }
  0x33   :  { %562 = vmatprep.subr.bf16.mxu1 %v709_v0 }
  0x35   :  { %543 = vmatpush3.bf16.msra.mxu0 %v606_v4 }
  0x36   :  { %544 = vmatprep.subr.bf16.mxu0 %v709_v0  ;;  %563 = vmatpush3.bf16.msra.mxu1 %v614_v14 }
  0x37   :  { %564 = vmatprep.subr.bf16.mxu1 %v709_v0 }
  0x39   :  { %545 = vmatpush3.bf16.msra.mxu0 %v607_v5 }
  0x3a   :  { %546 = vmatprep.subr.bf16.mxu0 %v709_v0  ;;  %565 = vmatpush3.bf16.msra.mxu1 %v615_v15 }
  0x3b   :  { %566 = vmatprep.subr.bf16.mxu1 %v709_v0 }
  0x3d   :  { %547 = vmatpush3.bf16.msra.mxu0 %v608_v6 }
  0x3e   :  { %548 = vmatprep.subr.bf16.mxu0 %v709_v0  ;;  %567 = vmatpush3.bf16.msra.mxu1 %v616_v16 }
  0x3f   :  { %568 = vmatprep.subr.bf16.mxu1 %v709_v0 }
  0x41   :  { %549 = vmatpush3.bf16.msra.mxu0 %v609_v7 }
  0x42   :  { %550 = vmatprep.subr.bf16.mxu0 %v709_v0  ;;  %569 = vmatpush3.bf16.msra.mxu1 %v617_v17 }
  0x43   :  { %570 = vmatprep.subr.bf16.mxu1 %v709_v0 }
  0x45   :  { %551 = vmatpush3.bf16.msra.mxu0 %v610_v8 }
  0x46   :  { %576 = vmatprep.subr.bf16.mxu0 %v709_v0  ;;  %571 = vmatpush3.bf16.msra.mxu1 %v618_v18 }
  0x48   :  { %553 = vmatmul.mubr.bf16.vlgmr.msra.gmra.mrb[0].mxu0 %v61_v10 }
  0x49   :  { %592 = vmatprep.mubr.msk.bf16.mxu0 %vm710_vm0, %v709_v0  ;;  %577 = vmatpush3.bf16.msra.mxu0 %v619_v55 }
  0x4a   :  { %578 = vmatprep.subr.bf16.mxu0 %v709_v0 }
  0x4d   :  { %579 = vmatpush3.bf16.msra.mxu0 %v620_v56 }
  0x4e   :  { %580 = vmatprep.subr.bf16.mxu0 %v709_v0 }
  0x51   :  { %581 = vmatpush3.bf16.msra.mxu0 %v621_v57  ;;  %v500_v57 = vld [vmem:[%s833_s2 + $0x5] sm:$0x1] }
  0x52   :  { %582 = vmatprep.subr.bf16.mxu0 %v709_v0 }
  0x55   :  { %583 = vmatpush3.bf16.msra.mxu0 %v622_v58 }
  0x56   :  { %584 = vmatprep.subr.bf16.mxu0 %v709_v0 }
  0x59   :  { %585 = vmatpush3.bf16.msra.mxu0 %v623_v59 }
  0x5a   :  { %586 = vmatprep.subr.bf16.mxu0 %v709_v0 }
  0x5d   :  { %587 = vmatpush3.bf16.msra.mxu0 %v624_v60 }
  0x5e   :  { %588 = vmatprep.subr.bf16.mxu0 %v709_v0 }
  0x61   :  { %589 = vmatpush3.bf16.msra.mxu0 %v625_v61 }
  0x62   :  { %590 = vmatprep.subr.bf16.mxu0 %v709_v0 }
  0x65   :  { %591 = vmatpush3.bf16.msra.mxu0 %v626_v62 }
 0x11b   :  { %v144_v19 = vpop.f32.mrb[0].mxu0 }
 0x11c   :  { %v150_v20 = vrot.slane %v144_v19, 4  ;;  %v554_v21 = vpop.f32.mrb[1].mxu0 }
 0x11d   :  { %v147_v22 = vpop.f32.mrb[2].mxu0 }
 0x11e   :  { %v151_v23 = vadd.f32 %v150_v20, %v144_v19  ;;  %v555_v24 = vpop.f32.mrb[3].mxu0  ;;  %v489_v20 = vld [vmem:[%s833_s2 + $0x2] sm:$0x1] }
 0x120   :  { %v152_v25 = vrot.slane %v151_v23, 2 }
 0x122   :  { %v153_v26 = vadd.f32 %v152_v25, %v151_v23  ;;  %v490_v23 = vld [vmem:[%s833_s2 + $0x3] sm:$0x1] }
 0x124   :  { %v154_v27 = vrot.slane %v153_v26, 1 }
 0x126   :  { %v155_v28 = vadd.f32 %v154_v27, %v153_v26 }
 0x128   :  { %v156_v29 = vmul.f32 0.125, %v155_v28 }
 0x12a   :  { %v157_v30 = vsub.f32 %v144_v19, %v156_v29 }
 0x12c   :  { %v158_v31 = vmul.f32 %v157_v30, %v157_v30 }
 0x12e   :  { %v159_v32 = vrot.slane %v158_v31, 4 }
 0x130   :  { %v160_v33 = vadd.f32 %v159_v32, %v158_v31 }
 0x132   :  { %v161_v34 = vrot.slane %v160_v33, 2 }
 0x134   :  { %v162_v35 = vadd.f32 %v161_v34, %v160_v33 }
 0x136   :  { %v163_v36 = vrot.slane %v162_v35, 1 }
 0x138   :  { %v164_v37 = vadd.f32 %v163_v36, %v162_v35 }
 0x13a   :  { %v165_v38 = vmul.f32 0.125, %v164_v37 }
 0x13c   :  { %v166_v39 = vadd.f32 1e-05, %v165_v38 }
 0x13e   :  { %627 = vrsqrt.f32 %v166_v39 }
 0x148   :  { %v628_v44 = vpop.eup %627 }
 0x149   :  { %v168_v45 = vmul.f32 %v628_v44, %v59_v42 }
 0x14b   :  { %v169_v47 = vmul.f32 %v168_v45, %v156_v29  ;;  %v174_v48 = vrot.slane %v168_v45, %v789_v43 }
 0x14d   :  { %v170_v49 = vsub.f32 %v60_v46, %v169_v47  ;;  %v175_v50 = vmul.f32 %v174_v48, %v144_v19 }
 0x14f   :  { %v179_v51 = vrot.slane %v170_v49, %v789_v43 }
 0x151   :  { %v180_v52 = vadd.f32 %v179_v51, %v175_v50 }
 0x153   :  { %v181_v53 = vmax.f32 %v180_v52, 0.0 }
 0x155   :  { %v202_v54 = vpack.c.bf16 %v181_v53, %v181_v53 }
 0x157   :  { %573 = vmatmul.mubr.bf16.vlgmr.msra.gmra.mrb[0].mxu1 %v202_v54  ;;  %v499_v54 = vld [vmem:[%s833_s2 + $0x4] sm:$0x1] }
 0x22a   :  { %v285_v63 = vpop.f32.mrb[0].mxu1 }
 0x22b   :  { %v291_v1 = vrot.slane %v285_v63, 4  ;;  %v574_v2 = vpop.f32.mrb[1].mxu1 }
 0x22c   :  { %v288_v3 = vpop.f32.mrb[2].mxu1 }
 0x22d   :  { %v292_v4 = vadd.f32 %v291_v1, %v285_v63  ;;  %v575_v5 = vpop.f32.mrb[3].mxu1 }
 0x22f   :  { %v293_v6 = vrot.slane %v292_v4, 2 }
 0x231   :  { %v294_v7 = vadd.f32 %v293_v6, %v292_v4 }
 0x233   :  { %v295_v8 = vrot.slane %v294_v7, 1 }
 0x235   :  { %v296_v9 = vadd.f32 %v295_v8, %v294_v7 }
 0x237   :  { %v297_v10 = vmul.f32 0.125, %v296_v9 }
 0x239   :  { %v298_v11 = vsub.f32 %v285_v63, %v297_v10 }
 0x23b   :  { %v299_v12 = vmul.f32 %v298_v11, %v298_v11 }
 0x23d   :  { %v300_v13 = vrot.slane %v299_v12, 4 }
 0x23f   :  { %v301_v14 = vadd.f32 %v300_v13, %v299_v12 }
 0x241   :  { %v302_v15 = vrot.slane %v301_v14, 2 }
 0x243   :  { %v303_v16 = vadd.f32 %v302_v15, %v301_v14 }
 0x245   :  { %v304_v0 = vrot.slane %v303_v16, 1 }
 0x247   :  { %v305_v17 = vadd.f32 %v304_v0, %v303_v16 }
 0x249   :  { %v306_v18 = vmul.f32 0.125, %v305_v17 }
 0x24b   :  { %v307_v19 = vadd.f32 1e-05, %v306_v18 }
 0x24d   :  { %629 = vrsqrt.f32 %v307_v19 }
 0x257   :  { %v630_v21 = vpop.eup %629 }
 0x258   :  { %v309_v22 = vmul.f32 %v630_v21, %v489_v20 }
 0x25a   :  { %v310_v24 = vmul.f32 %v309_v22, %v297_v10  ;;  %v315_v25 = vrot.slane %v309_v22, %v789_v43 }
 0x25c   :  { %v311_v26 = vsub.f32 %v490_v23, %v310_v24  ;;  %v316_v27 = vmul.f32 %v315_v25, %v285_v63 }
 0x25e   :  { %v320_v28 = vrot.slane %v311_v26, %v789_v43 }
 0x260   :  { %v321_v29 = vadd.f32 %v320_v28, %v316_v27 }
 0x262   :  { %v322_v30 = vmax.f32 %v321_v29, 0.0 }
 0x264   :  { %v343_v31 = vpack.c.bf16 %v322_v30, %v322_v30 }
 0x266   :  { %593 = vmatmul.mubr.bf16.vlgmr.msra.gmra.mrb[4].mxu0 %v343_v31 }
 0x339   :  { %v426_v32 = vpop.f32.mrb[4].mxu0 }
 0x33a   :  { %v432_v33 = vrot.slane %v426_v32, 4  ;;  %v594_v34 = vpop.f32.mrb[5].mxu0 }
 0x33b   :  { %v429_v35 = vpop.f32.mrb[6].mxu0 }
 0x33c   :  { %v433_v36 = vadd.f32 %v432_v33, %v426_v32  ;;  %v595_v37 = vpop.f32.mrb[7].mxu0 }
 0x33e   :  { %v434_v38 = vrot.slane %v433_v36, 2 }
 0x340   :  { %v435_v39 = vadd.f32 %v434_v38, %v433_v36 }
 0x342   :  { %v436_v40 = vrot.slane %v435_v39, 1 }
 0x344   :  { %v437_v41 = vadd.f32 %v436_v40, %v435_v39 }
 0x346   :  { %v438_v42 = vmul.f32 0.125, %v437_v41 }
 0x348   :  { %v439_v44 = vsub.f32 %v426_v32, %v438_v42 }
 0x34a   :  { %v440_v45 = vmul.f32 %v439_v44, %v439_v44 }
 0x34c   :  { %v441_v46 = vrot.slane %v440_v45, 4 }
 0x34e   :  { %v442_v47 = vadd.f32 %v441_v46, %v440_v45 }
 0x350   :  { %v443_v48 = vrot.slane %v442_v47, 2 }
 0x352   :  { %v444_v49 = vadd.f32 %v443_v48, %v442_v47 }
 0x354   :  { %v445_v50 = vrot.slane %v444_v49, 1 }
 0x356   :  { %v446_v51 = vadd.f32 %v445_v50, %v444_v49 }
 0x358   :  { %v447_v52 = vmul.f32 0.125, %v446_v51 }
 0x35a   :  { %v448_v53 = vadd.f32 1e-05, %v447_v52 }
 0x35c   :  { %631 = vrsqrt.f32 %v448_v53 }
 0x366   :  { %v632_v55 = vpop.eup %631 }
 0x367   :  { %v450_v56 = vmul.f32 %v632_v55, %v499_v54 }
 0x369   :  { %v451_v58 = vmul.f32 %v450_v56, %v438_v42  ;;  %v456_v59 = vrot.slane %v450_v56, %v789_v43 }
 0x36b   :  { %v452_v60 = vsub.f32 %v500_v57, %v451_v58  ;;  %v457_v61 = vmul.f32 %v456_v59, %v426_v32 }
 0x36d   :  { %v461_v62 = vrot.slane %v452_v60, %v789_v43 }
 0x36f   :  { %v462_v63 = vadd.f32 %v461_v62, %v457_v61 }
 0x371   :  { %v463_v1 = vmax.f32 %v462_v63, 0.0 }
 0x373   :  { %464 = vst [vmem:[#allocation7] sm:$0xff] %v463_v1 }
 0x374   :  { %688 = shalt.err (!%p685_p6)
}
 0x375   :  { %s689_s25 = scalar_lea.hbm %s834_s3, 128 }
 0x376   :  { %p690_p7 = scmp.ne.s32.totalorder %s834_s3, %s689_s25  ;;  %p693_p8 = scmp.lt.u32.totalorder %s689_s25, %s834_s3 }
 0x378   :  { %p695_p9 = pnand %p693_p8, %p690_p7 }
 0x37a   :  { %698 = shalt.err (!%p695_p9)
}
 0x37b   :  { %474 = dma.vmem_to_hbm [thread:$0]  %s472_s22, 128, %s834_s3, [#allocation4]  }
 0x37c   :  { %703 = dma.done.wait [#allocation4], 128  }
 0x37d   :  { %704 = vsyncadd [#allocation4], 4294967168 }
 0x37e   :  { %478 = vsyncpa [#allocation3], 1 }
 0x37f   :  { %479 = vsyncpa [#allocation6], 1 }
 0x380   :  { %480 = vsyncpa [#allocation4], 1 }

</bundles_post_ra>
